<compile_context>
chip_gen: v5e
topology: v5e:2x2
jax: 0.10.0
libtpu: 0.0.40
codegen_flags: <defaults>
</compile_context>

<pallas_src>
import jax
import jax.numpy as jnp
from jax import lax
from jax.experimental import pallas as pl
from jax.experimental.pallas import tpu as pltpu


def _two_layer_kernel(x_ref, w1_ref, b1_ref, w2_ref, b2_ref, o_ref):
    # h = relu(x @ W1^T + b1); W1 kept in PyTorch [H, D_in] layout, so contract
    # x dim 1 against W1 dim 1 directly (no wrapper-side transpose / HBM pass).
    h = lax.dot_general(
        x_ref[...], w1_ref[...],
        dimension_numbers=(((1,), (1,)), ((), ())),
        preferred_element_type=jnp.float32)
    h = jnp.maximum(h + b1_ref[...], 0.0)            # bias + ReLU in f32 (VPU)
    # y = h @ W2^T + b2 ; W2 is [D_out, H].
    y = lax.dot_general(
        h.astype(w2_ref.dtype), w2_ref[...],
        dimension_numbers=(((1,), (1,)), ((), ())),
        preferred_element_type=jnp.float32)
    o_ref[...] = (y + b2_ref[...]).astype(o_ref.dtype)


def two_layer_net(x, w1, b1, w2, b2, *, block_b=256):
    """Fused forward of TwoLayerNet.

    x : [B, D_in]
    w1: [H, D_in]    (PyTorch nn.Linear layout, NOT transposed)
    b1: [1, H]
    w2: [D_out, H]   (PyTorch nn.Linear layout, NOT transposed)
    b2: [1, D_out]
    """
    B, D_in = x.shape
    H = w1.shape[0]
    D_out = w2.shape[0]
    assert b1.shape == (1, H) and b2.shape == (1, D_out)

    flops = 2 * B * D_in * H + 2 * B * H * D_out
    bytes_accessed = sum(int(a.size) * a.dtype.itemsize
                         for a in (x, w1, b1, w2, b2))
    bytes_accessed += B * D_out * x.dtype.itemsize
    cost = pl.CostEstimate(flops=flops, transcendentals=0,
                           bytes_accessed=bytes_accessed)

    out_shape = jax.ShapeDtypeStruct((B, D_out), x.dtype)

    if B <= block_b:
        # Small batch: single shot, everything is one resident VMEM block;
        # no grid => no 1-step pipeline prologue/epilogue overhead.
        return pl.pallas_call(
            _two_layer_kernel,
            out_shape=out_shape,
            in_specs=[pl.BlockSpec(memory_space=pltpu.MemorySpace.VMEM)] * 5,
            out_specs=pl.BlockSpec(memory_space=pltpu.MemorySpace.VMEM),
            cost_estimate=cost,
        )(x, w1, b1, w2, b2)

    # Large batch: pipeline x/out tiles over a batch grid; weights & biases
    # stay VMEM-resident across grid steps (constant index_map), batch axis
    # is "parallel" so v7x can shard it across its two TensorCores.
    grid = (pl.cdiv(B, block_b),)
    return pl.pallas_call(
        _two_layer_kernel,
        out_shape=out_shape,
        grid_spec=pltpu.PrefetchScalarGridSpec(
            num_scalar_prefetch=0,
            grid=grid,
            in_specs=[
                pl.BlockSpec((block_b, D_in), lambda i: (i, 0)),
                pl.BlockSpec((H, D_in), lambda i: (0, 0)),
                pl.BlockSpec((1, H), lambda i: (0, 0)),
                pl.BlockSpec((D_out, H), lambda i: (0, 0)),
                pl.BlockSpec((1, D_out), lambda i: (0, 0)),
            ],
            out_specs=pl.BlockSpec((block_b, D_out), lambda i: (i, 0)),
        ),
        compiler_params=pltpu.CompilerParams(
            dimension_semantics=("parallel",)),
        cost_estimate=cost,
    )(x, w1, b1, w2, b2)


if __name__ == "__main__":
    # Shapes implied by TwoLayerNet(D_in, H, D_out): x is [batch, D_in].
    B, D_in, H, D_out = 8, 32, 64, 16

    key = jax.random.PRNGKey(0)
    kx, kw1, kb1, kw2, kb2 = jax.random.split(key, 5)

    # Parameters built ONCE in kernel-friendly layout: PyTorch [out, in]
    # weights, biases stored [1, N]. No per-call reshape/transpose.
    x = jax.random.normal(kx, (B, D_in), dtype=jnp.float32)
    w1 = jax.random.uniform(kw1, (H, D_in), jnp.float32, -1.0, 1.0) / jnp.sqrt(D_in)
    b1 = jax.random.uniform(kb1, (1, H), jnp.float32, -1.0, 1.0) / jnp.sqrt(D_in)
    w2 = jax.random.uniform(kw2, (D_out, H), jnp.float32, -1.0, 1.0) / jnp.sqrt(H)
    b2 = jax.random.uniform(kb2, (1, D_out), jnp.float32, -1.0, 1.0) / jnp.sqrt(H)

    def ref(x_, w1_, b1_, w2_, b2_):
        return jnp.maximum(x_ @ w1_.T + b1_, 0.0) @ w2_.T + b2_

    # 1) Small-batch path (gridless, fully VMEM-resident).
    y = jax.block_until_ready(two_layer_net(x, w1, b1, w2, b2))
    assert y.shape == (B, D_out)
    assert jnp.allclose(y, ref(x, w1, b1, w2, b2), atol=2e-5, rtol=2e-5)

    # 2) Batch-tiled path (grid over B, weights resident, "parallel" axis).
    B_big = 512
    x_big = jax.random.normal(jax.random.PRNGKey(1), (B_big, D_in), jnp.float32)
    y_big = jax.block_until_ready(
        two_layer_net(x_big, w1, b1, w2, b2, block_b=128))
    assert y_big.shape == (B_big, D_out)
    assert jnp.allclose(y_big, ref(x_big, w1, b1, w2, b2), atol=2e-5, rtol=2e-5)

    print("KERNEL_OK")
</pallas_src>

<mosaic_0001>
module attributes {stable_mosaic.version = 11 : i64} {
  func.func @_two_layer_kernel(%arg0: memref<8x32xf32, #tpu.memory_space<vmem>>, %arg1: memref<64x32xf32, #tpu.memory_space<vmem>>, %arg2: memref<1x64xf32, #tpu.memory_space<vmem>>, %arg3: memref<16x64xf32, #tpu.memory_space<vmem>>, %arg4: memref<1x16xf32, #tpu.memory_space<vmem>>, %arg5: memref<8x16xf32, #tpu.memory_space<vmem>>) attributes {dimension_semantics = [], scalar_prefetch = 0 : i64, scratch_operands = 0 : i64, tpu.core_type = #tpu.core_type<tc>} {
    %c0 = arith.constant 0 : index
    %c0_0 = arith.constant 0 : index
    %0 = vector.load %arg0[%c0, %c0_0] : memref<8x32xf32, #tpu.memory_space<vmem>>, vector<8x32xf32>
    %c0_1 = arith.constant 0 : index
    %c0_2 = arith.constant 0 : index
    %1 = vector.load %arg1[%c0_1, %c0_2] : memref<64x32xf32, #tpu.memory_space<vmem>>, vector<64x32xf32>
    %cst = arith.constant dense<0.000000e+00> : vector<8x64xf32>
    %2 = tpu.matmul %0, %1, %cst {dimension_numbers = #tpu.dot_dimension_numbers<[1], [1], [0], [0], [0, 0, 1, 0], [], []>} : vector<8x32xf32>, vector<64x32xf32>, vector<8x64xf32> -> vector<8x64xf32>
    %c0_3 = arith.constant 0 : index
    %c0_4 = arith.constant 0 : index
    %3 = vector.load %arg2[%c0_3, %c0_4] : memref<1x64xf32, #tpu.memory_space<vmem>>, vector<1x64xf32>
    %4 = vector.broadcast %3 : vector<1x64xf32> to vector<8x64xf32>
    %5 = arith.addf %2, %4 : vector<8x64xf32>
    %cst_5 = arith.constant 0.000000e+00 : f32
    %6 = vector.broadcast %cst_5 : f32 to vector<8x64xf32>
    %7 = arith.maximumf %5, %6 : vector<8x64xf32>
    %c0_6 = arith.constant 0 : index
    %c0_7 = arith.constant 0 : index
    %8 = vector.load %arg3[%c0_6, %c0_7] : memref<16x64xf32, #tpu.memory_space<vmem>>, vector<16x64xf32>
    %cst_8 = arith.constant dense<0.000000e+00> : vector<8x16xf32>
    %9 = tpu.matmul %7, %8, %cst_8 {dimension_numbers = #tpu.dot_dimension_numbers<[1], [1], [0], [0], [0, 0, 1, 0], [], []>} : vector<8x64xf32>, vector<16x64xf32>, vector<8x16xf32> -> vector<8x16xf32>
    %c0_9 = arith.constant 0 : index
    %c0_10 = arith.constant 0 : index
    %10 = vector.load %arg4[%c0_9, %c0_10] : memref<1x16xf32, #tpu.memory_space<vmem>>, vector<1x16xf32>
    %11 = vector.broadcast %10 : vector<1x16xf32> to vector<8x16xf32>
    %12 = arith.addf %9, %11 : vector<8x16xf32>
    %c0_11 = arith.constant 0 : index
    %c0_12 = arith.constant 0 : index
    %13 = vector.load %arg5[%c0_11, %c0_12] : memref<8x16xf32, #tpu.memory_space<vmem>>, vector<8x16xf32>
    tpu.vector_store %arg5[%c0_11, %c0_12], %12 {strides = array<i32>} : memref<8x16xf32, #tpu.memory_space<vmem>>, vector<8x16xf32>,
    return
  }
}

</mosaic_0001>

<bundles_post_ra>
// kernel: tpu_custom_call.1
= control target key start
LH: loop header
LB: loop body
LE: loop exit
PB: predicated region body
PF: predicated region fallthrough
CT: control target
= control target key end

     0   :  { %vm34_vm0 = vcmask 261120   ;;  %vm89_vm1 = vcmask 523264   ;;  %s263_s0 = inlined_call_operand.vmem [shape: f32[8,32], index: 0, kind: input, shape index: {}]   ;;  %s264_s1 = inlined_call_operand.vmem [shape: f32[64,32], index: 1, kind: input, shape index: {}]   ;;  %s265_s2 = inlined_call_operand.vmem [shape: f32[1,64], index: 2, kind: input, shape index: {}]   ;;  %s266_s3 = inlined_call_operand.vmem [shape: f32[16,64], index: 3, kind: input, shape index: {}]   ;;  %s267_s4 = inlined_call_operand.vmem [shape: f32[1,16], index: 4, kind: input, shape index: {}]   ;;  %s268_s5 = inlined_call_operand.hbm [shape: f32[8,16], index: 5, kind: output, shape index: {}]  }
   0x1   :  { %v29_v0 = vld [vmem:[%s264_s1 + $0x38] sm:$0xff]  ;;  %v28_v1 = vld [vmem:[%s264_s1 + $0x30] sm:$0xff]  ;;  %v84_v2 = vld [vmem:[%s266_s3 + $0x8] sm:$0xff] }
   0x2   :  { %137 = vmatpush.xpose.msk.msra.mxu0 %vm34_vm0, %v29_v0  ;;  %146 = vmatpush.xpose.msk.msra.mxu1 %vm89_vm1, %v84_v2 }
   0x3   :  { %10 = vsyncpa [#allocation3], 0  ;;  %v27_v3 = vld [vmem:[%s264_s1 + $0x28] sm:$0xff]  ;;  %v26_v4 = vld [vmem:[%s264_s1 + $0x20] sm:$0xff]  ;;  %vm119_vm2 = vcmask 130048  }
   0x4   :  { %v25_v5 = vld [vmem:[%s264_s1 + $0x18] sm:$0xff]  ;;  %v24_v6 = vld [vmem:[%s264_s1 + $0x10] sm:$0xff]  ;;  %v23_v7 = vld [vmem:[%s264_s1 + $0x8] sm:$0xff] }
   0x5   :  { %v22_v8 = vld [vmem:[%s264_s1] sm:$0xff] }
   0x6   :  { %138 = vmatpush.xpose.msk.msra.mxu0 %vm34_vm0, %v28_v1  ;;  %v21_v9 = vld [vmem:[%s263_s0] sm:$0xff]  ;;  %s178_s0 = smov [#allocation2]  }
   0x7   :  { %v83_v10 = vld [vmem:[%s266_s3] sm:$0xff]  ;;  %s126_s18 = sshll.u32 %s178_s0, 4  ;;  %s128_s3 = sshll.u32 %s268_s5, 4  ;;  %s127_s18 = int_to_ptr.vmem [resolvable:$true] %s126_s18  ;;  %s129_s3 = int_to_ptr.hbm [resolvable:$true] %s128_s3 }
   0x8   :  { %147 = vmatpush.xpose.msk.msra.mxu1 %vm89_vm1, %v83_v10  ;;  %v150_v11 = vld [vmem:[%s265_s2] ss:$0 sm:$0xff] }
   0x9   :  { %v151_v15 = vld [vmem:[%s267_s4] ss:$0 sm:$0xff] }
   0xa   :  { %139 = vmatpush.xpose.msk.msra.mxu0 %vm34_vm0, %v27_v3 }
   0xe   :  { %140 = vmatpush.xpose.msk.msra.mxu0 %vm34_vm0, %v26_v4 }
  0x12   :  { %141 = vmatpush.xpose.msk.msra.mxu0 %vm34_vm0, %v25_v5 }
  0x16   :  { %142 = vmatpush.xpose.msk.msra.mxu0 %vm34_vm0, %v24_v6 }
  0x1a   :  { %143 = vmatpush.xpose.msk.msra.mxu0 %vm34_vm0, %v23_v7 }
  0x1e   :  { %144 = vmatpush.xpose.msk.msra.mxu0 %vm34_vm0, %v22_v8 }
  0x21   :  { %145 = vmatmul.msk.f32.vlgmr.msra.gmra.mxu0 %vm34_vm0, %v21_v9 }
  0x9e   :  { %v79_v12 = vpop.f32.mrf.mxu0 }
  0x9f   :  { %v80_v13 = vadd.f32 %v150_v11, %v79_v12 }
  0xa1   :  { %v82_v14 = vmax.f32 %v80_v13, 0.0 }
  0xa3   :  { %148 = vmatmul.msk.f32.vlgmr.msra.gmra.mxu1 %vm89_vm1, %v82_v14 }
 0x120   :  { %v116_v16 = vpop.f32.mrf.mxu1 }
 0x121   :  { %v117_v17 = vadd.f32 %v151_v15, %v116_v16 }
 0x123   :  { %120 = vst.msk [vmem:[#allocation2] sm:$0xff] %vm119_vm2, %v117_v17 }
 0x124   :  { %131 = dma.vmem_to_hbm [thread:$0]  %s127_s18, 128, %s129_s3, [#allocation3]  }
 0x125   :  { %176 = dma.done.wait [#allocation3], 128  }
 0x126   :  { %177 = vsyncadd [#allocation3], 4294967168 }
 0x127   :  { %136 = vsyncpa [#allocation3], 1 }

</bundles_post_ra>
